<compile_context>
chip_gen: v6e
topology: v6e:2x2x1
jax: 0.10.0
libtpu: 0.0.40
codegen_flags: <defaults>
</compile_context>

<pallas_src>
from functools import partial

import jax
import jax.numpy as jnp
from jax import lax
from jax.experimental import pallas as pl
from jax.experimental.pallas import tpu as pltpu

BN_EPS = 1e-5
NEG_SLOPE = 0.01                       # nn.LeakyReLU(0.01)


def _vmem_budget():
    """Generation-aware scoped-VMEM budget (~38 MiB v7x, ~76 MiB v5e/v6e)."""
    try:
        cap = getattr(pltpu.get_tpu_info(), "vmem_capacity_bytes", None)
        if cap:
            return int(0.6 * cap)
    except Exception:
        pass
    return 48 * 1024 * 1024


def _activation(y, leaky):
    if leaky:
        return jnp.where(y > 0, y, NEG_SLOPE * y)   # LeakyReLU(0.01)
    return jnp.maximum(y, 0.0)                      # ReLU (act=False path, per module)


# ---------------------------------------------------------------------------
# Kernel 1: 1x1 conv (pointwise channel matmul) + folded-BN bias + activation
# ---------------------------------------------------------------------------
def _conv1x1_kernel(x_ref, w_ref, b_ref, o_ref, *, leaky):
    # x_ref: (TM, Cin) bf16   w_ref: (Cin, Cout) bf16   b_ref: (1, Cout) f32
    y = jnp.dot(x_ref[...], w_ref[...], preferred_element_type=jnp.float32)
    y = y + b_ref[...]
    o_ref[...] = _activation(y, leaky).astype(o_ref.dtype)


def _conv1x1(x_flat, w_mat, bias, leaky, row_tile, budget):
    M, cin = x_flat.shape
    cout = w_mat.shape[1]
    if row_tile is None:
        # bytes/row: double-buffered bf16 input + double-buffered bf16 output + f32 temp
        per_row = 4 * cin + 8 * cout + 16
        row_tile = max(8, (budget // 2 - 2 * cin * cout) // per_row)
    tm = int(min(row_tile, 2048, M))
    if tm < M:
        tm = max(8, (tm // 8) * 8)
    cost = pl.CostEstimate(
        flops=2 * M * cin * cout,
        transcendentals=0,
        bytes_accessed=M * cin * 2 + cin * cout * 2 + M * cout * 2,
    )
    return pl.pallas_call(
        partial(_conv1x1_kernel, leaky=leaky),
        out_shape=jax.ShapeDtypeStruct((M, cout), jnp.bfloat16),
        grid=(pl.cdiv(M, tm),),
        in_specs=[
            pl.BlockSpec((tm, cin), lambda i: (i, 0)),
            pl.BlockSpec((cin, cout), lambda i: (0, 0)),
            pl.BlockSpec((1, cout), lambda i: (0, 0)),
        ],
        out_specs=pl.BlockSpec((tm, cout), lambda i: (i, 0)),
        compiler_params=pltpu.CompilerParams(
            dimension_semantics=("parallel",),
            vmem_limit_bytes=budget,
        ),
        cost_estimate=cost,
    )(x_flat, w_mat, bias)


# ---------------------------------------------------------------------------
# Kernel 2: 3x3 conv (stride 1, pad 1) + folded-BN bias + activation.
# Row-tiled, double-buffered manual halo DMA from un-padded HBM input; zero
# padding is produced in-kernel.
# ---------------------------------------------------------------------------
def _conv3x3_kernel(x_hbm, w_ref, b_ref, o_ref, xbuf, sem, *, th, leaky, wide_k):
    # x_hbm : (N, H, W, Cin) bf16, un-padded, stays in HBM (memory_space=pl.ANY)
    # w_ref : (9, Cin, Cout) or (3, 3*Cin, Cout) bf16 (BN scale folded in)
    # b_ref : (1, Cout) f32        o_ref: (TH, W, Cout) bf16
    # xbuf  : (2, TH+2, W+2, Cin) bf16 double-buffered halo slab
    # sem   : (2, 3) DMA semaphores  [slot, {body, top halo row, bottom halo row}]
    n = pl.program_id(0)
    h = pl.program_id(1)
    n_h = pl.num_programs(1)
    H = n_h * th
    slot = h % 2
    th_o, w_o, cout = o_ref.shape

    def _dma(nn, hh, sl):
        # Single descriptor helper used for both start() and wait() so they match.
        body = pltpu.make_async_copy(
            x_hbm.at[nn, pl.ds(hh * th, th)],
            xbuf.at[sl, pl.ds(1, th), pl.ds(1, w_o)],
            sem.at[sl, 0])
        top = pltpu.make_async_copy(
            x_hbm.at[nn, jnp.maximum(hh * th - 1, 0)],
            xbuf.at[sl, 0, pl.ds(1, w_o)],
            sem.at[sl, 1])
        bot = pltpu.make_async_copy(
            x_hbm.at[nn, jnp.minimum(hh * th + th, H - 1)],
            xbuf.at[sl, th + 1, pl.ds(1, w_o)],
            sem.at[sl, 2])
        return body, top, bot

    def _start(nn, hh, sl):
        body, top, bot = _dma(nn, hh, sl)
        body.start()

        @pl.when(hh > 0)
        def _():
            top.start()

        @pl.when(hh < n_h - 1)
        def _():
            bot.start()

    def _wait(nn, hh, sl):
        body, top, bot = _dma(nn, hh, sl)
        body.wait()

        @pl.when(hh > 0)
        def _():
            top.wait()

        @pl.when(hh < n_h - 1)
        def _():
            bot.wait()

    # Prime the pipeline at the first row tile of every image.
    @pl.when(h == 0)
    def _():
        _start(n, h, slot)

    # Prefetch the next row tile of the same image into the other buffer slot
    # (stays within the image, so it is safe when the batch axis is core-split).
    # TODO(synk): also prefetch (n+1, 0) at h == n_h-1 to hide the per-image bubble.
    @pl.when(h + 1 < n_h)
    def _():
        _start(n, h + 1, 1 - slot)

    _wait(n, h, slot)

    # In-kernel zero padding: kill the halo columns (never DMA'd) and the halo rows
    # with no source row (first / last row tile of the image).
    tile = xbuf[slot]                                   # (TH+2, W+2, Cin) bf16
    wp = tile.shape[1]
    row = lax.broadcasted_iota(jnp.int32, tile.shape, 0)
    col = lax.broadcasted_iota(jnp.int32, tile.shape, 1)
    invalid = ((col == 0) | (col == wp - 1)
               | ((row == 0) & (h == 0))
               | ((row == th + 1) & (h == n_h - 1)))
    tile = jnp.where(invalid, jnp.zeros_like(tile), tile)

    # Build the three dx-shifted slabs once per tile (hoisted out of the dy loop).
    slabs = tuple(tile[:, dx:dx + w_o, :] for dx in range(3))

    acc = jnp.zeros((th_o, w_o, cout), jnp.float32)
    if wide_k:
        # K = 3*Cin contraction: 3 matmuls instead of 9 (Cin is lane-aligned).
        wide = jnp.concatenate(slabs, axis=-1)          # (TH+2, W, 3*Cin)
        for dy in range(3):
            acc = acc + lax.dot_general(
                wide[dy:dy + th_o], w_ref[dy],
                (((2,), (0,)), ((), ())), preferred_element_type=jnp.float32)
    else:
        for dy in range(3):
            for dx in range(3):
                acc = acc + lax.dot_general(
                    slabs[dx][dy:dy + th_o], w_ref[dy * 3 + dx],
                    (((2,), (0,)), ((), ())), preferred_element_type=jnp.float32)

    y = acc + b_ref[...]
    o_ref[...] = _activation(y, leaky).astype(o_ref.dtype)


def _conv3x3(x, w_pack, bias, leaky, row_tile, wide_k, budget):
    N, H, W, cin = x.shape
    cout = w_pack.shape[-1]

    # Budget-aware row-tile height: double-buffered input slab + 3 dx slabs (bf16),
    # double-buffered bf16 output block, f32 accumulator; weights stay resident.
    per_row = W * (10 * cin + 12 * cout) + 64
    weight_bytes = 18 * cin * cout
    cap = max(1, (budget // 2 - weight_bytes) // per_row)
    target = min(64, cap, H) if row_tile is None else min(row_tile, H)
    target = max(1, int(target))
    th = 1
    for d in range(target, 0, -1):         # largest divisor of H that is <= target
        if H % d == 0:
            th = d
            break
    n_h = H // th

    cost = pl.CostEstimate(
        flops=2 * N * H * W * 9 * cin * cout,
        transcendentals=0,
        bytes_accessed=N * H * W * cin * 2 + weight_bytes + N * H * W * cout * 2,
    )
    return pl.pallas_call(
        partial(_conv3x3_kernel, th=th, leaky=leaky, wide_k=wide_k),
        out_shape=jax.ShapeDtypeStruct((N, H, W, cout), jnp.bfloat16),
        grid=(N, n_h),
        in_specs=[
            pl.BlockSpec(memory_space=pl.ANY),                  # activations stay in HBM
            pl.BlockSpec(w_pack.shape, lambda n, h: (0, 0, 0)),
            pl.BlockSpec((1, cout), lambda n, h: (0, 0)),
        ],
        out_specs=pl.BlockSpec((None, th, W, cout), lambda n, h: (n, h, 0, 0)),
        scratch_shapes=[
            pltpu.VMEM((2, th + 2, W + 2, cin), jnp.bfloat16),
            pltpu.SemaphoreType.DMA((2, 3)),
        ],
        compiler_params=pltpu.CompilerParams(
            dimension_semantics=("parallel", "arbitrary"),
            vmem_limit_bytes=budget,
        ),
        cost_estimate=cost,
    )(x, w_pack, bias)


# ---------------------------------------------------------------------------
# Wrappers: Conv.forward = act(BN(conv(x)))
# ---------------------------------------------------------------------------
def conv_forward_nhwc(x_nhwc, weight_oihw, gamma, beta, mean, var, *,
                      stride=1, groups=1, act=True, row_tile=None):
    """Primary entry point: NHWC input, NHWC bf16 output (keep NHWC between layers)."""
    if stride != 1 or groups != 1:
        raise NotImplementedError("only stride=1, groups=1 are implemented")
    c_out, c_in, kh, kw = weight_oihw.shape
    assert kh == kw and kh in (1, 3), "only k in {1, 3} implemented"
    N, H, W, cx = x_nhwc.shape
    assert cx == c_in

    # Fold eval-mode BatchNorm: scale into the weights, shift into the epilogue bias.
    scale = gamma / jnp.sqrt(var + BN_EPS)
    bias = (beta - mean * scale).reshape(1, c_out).astype(jnp.float32)
    w_folded = weight_oihw.astype(jnp.float32) * scale[:, None, None, None]

    x_bf16 = x_nhwc.astype(jnp.bfloat16)
    budget = _vmem_budget()

    if kh == 1:                                    # pointwise conv, pad = 0
        w_mat = jnp.transpose(w_folded[:, :, 0, 0], (1, 0)).astype(jnp.bfloat16)
        x_flat = x_bf16.reshape(N * H * W, c_in)
        y = _conv1x1(x_flat, w_mat, bias, act, row_tile, budget)
        return y.reshape(N, H, W, c_out)

    # 3x3 conv, pad = 1.  (O, I, 3, 3) -> (3, 3, I, O); row-major index = dy*3 + dx.
    w_hw = jnp.transpose(w_folded, (2, 3, 1, 0))
    wide_k = (c_in % 128 == 0)
    if wide_k:
        w_pack = w_hw.reshape(3, 3 * c_in, c_out).astype(jnp.bfloat16)
    else:
        w_pack = w_hw.reshape(9, c_in, c_out).astype(jnp.bfloat16)
    return _conv3x3(x_bf16, w_pack, bias, act, row_tile, wide_k, budget)


def conv_forward(x_nchw, weight_oihw, gamma, beta, mean, var, *,
                 stride=1, groups=1, act=True, row_tile=None):
    """PyTorch-layout convenience wrapper (NCHW in / NCHW bf16 out).

    In a full network call conv_forward_nhwc directly so the two transpose passes
    only happen at the network boundary, not per layer."""
    x_nhwc = jnp.transpose(x_nchw, (0, 2, 3, 1))
    y = conv_forward_nhwc(x_nhwc, weight_oihw, gamma, beta, mean, var,
                          stride=stride, groups=groups, act=act, row_tile=row_tile)
    return jnp.transpose(y, (0, 3, 1, 2))


# ---------------------------------------------------------------------------
# Pure-JAX reference (same bf16-rounded inputs, f32 math) for the check
# ---------------------------------------------------------------------------
def ref_conv_forward(x_nchw, weight_oihw, gamma, beta, mean, var, act=True):
    scale = gamma / jnp.sqrt(var + BN_EPS)
    bias = beta - mean * scale
    w_folded = weight_oihw * scale[:, None, None, None]
    xb = x_nchw.astype(jnp.bfloat16).astype(jnp.float32)
    wb = w_folded.astype(jnp.bfloat16).astype(jnp.float32)
    x_nhwc = jnp.transpose(xb, (0, 2, 3, 1))
    w_hwio = jnp.transpose(wb, (2, 3, 1, 0))
    p = weight_oihw.shape[2] // 2
    y = lax.conv_general_dilated(
        x_nhwc, w_hwio, (1, 1), ((p, p), (p, p)),
        dimension_numbers=("NHWC", "HWIO", "NHWC"))
    y = y + bias
    y = jnp.where(y > 0, y, NEG_SLOPE * y) if act else jnp.maximum(y, 0.0)
    return jnp.transpose(y, (0, 3, 1, 2))


def _assert_close(out, ref, name, atol=2e-2, rtol=2e-2):
    o = out.astype(jnp.float32)
    ok = bool(jnp.allclose(o, ref, atol=atol, rtol=rtol))
    assert ok, f"{name}: max abs err {float(jnp.max(jnp.abs(o - ref)))}"


if __name__ == "__main__":
    key = jax.random.PRNGKey(0)
    kx, kw1, kw2, kw3, kx3, kbn = jax.random.split(key, 6)

    def make_bn(k, c):
        kg, kb, km, kv = jax.random.split(k, 4)
        gamma = 1.0 + 0.1 * jax.random.normal(kg, (c,), jnp.float32)
        beta = 0.1 * jax.random.normal(kb, (c,), jnp.float32)
        mean = 0.1 * jax.random.normal(km, (c,), jnp.float32)
        var = jnp.abs(jax.random.normal(kv, (c,), jnp.float32)) + 0.5
        return gamma, beta, mean, var

    N, C_IN, H, W = 2, 8, 16, 16
    x = jax.random.normal(kx, (N, C_IN, H, W), jnp.float32)

    # Case 1: Conv(8->16, k=1, act=True) -> pointwise kernel, LeakyReLU path.
    c1 = 16
    w1 = 0.1 * jax.random.normal(kw1, (c1, C_IN, 1, 1), jnp.float32)
    bn1 = make_bn(jax.random.fold_in(kbn, 1), c1)
    out1 = jax.block_until_ready(conv_forward(x, w1, *bn1, act=True, row_tile=128))
    ref1 = ref_conv_forward(x, w1, *bn1, act=True)
    assert out1.shape == (N, c1, H, W)
    _assert_close(out1, ref1, "1x1")

    # Case 2: Conv(8->8, k=3, act=False) -> 3x3 halo-DMA kernel, ReLU path.
    c2 = 8
    w2 = 0.1 * jax.random.normal(kw2, (c2, C_IN, 3, 3), jnp.float32)
    bn2 = make_bn(jax.random.fold_in(kbn, 2), c2)
    ref2 = ref_conv_forward(x, w2, *bn2, act=False)
    # Forced small tile: exercises interior tiles + halo-row DMAs + first/last masking.
    out2a = jax.block_until_ready(conv_forward(x, w2, *bn2, act=False, row_tile=4))
    assert out2a.shape == (N, c2, H, W)
    _assert_close(out2a, ref2, "3x3 tiled")
    # Default tile selection (whole image in one tile at this size).
    out2b = jax.block_until_ready(conv_forward(x, w2, *bn2, act=False))
    _assert_close(out2b, ref2, "3x3 default")

    # Case 3: Conv(128->128, k=3, act=True) -> wide-K (K = 3*Cin) MXU path.
    N3, C3, H3, W3 = 1, 128, 8, 8
    x3 = jax.random.normal(kx3, (N3, C3, H3, W3), jnp.float32)
    w3 = 0.05 * jax.random.normal(kw3, (C3, C3, 3, 3), jnp.float32)
    bn3 = make_bn(jax.random.fold_in(kbn, 3), C3)
    out3 = jax.block_until_ready(conv_forward(x3, w3, *bn3, act=True, row_tile=4))
    ref3 = ref_conv_forward(x3, w3, *bn3, act=True)
    assert out3.shape == (N3, C3, H3, W3)
    _assert_close(out3, ref3, "3x3 wide-K")

    print("KERNEL_OK")
</pallas_src>

<mosaic_0001>
module attributes {stable_mosaic.version = 11 : i64} {
  func.func @_conv1x1_kernel(%arg0: i32, %arg1: memref<128x8xbf16, #tpu.memory_space<vmem>>, %arg2: memref<8x16xbf16, #tpu.memory_space<vmem>>, %arg3: memref<1x16xf32, #tpu.memory_space<vmem>>, %arg4: memref<128x16xbf16, #tpu.memory_space<vmem>>) attributes {dimension_semantics = [#tpu.dimension_semantics<parallel>], iteration_bounds = array<i64: 4>, scalar_prefetch = 0 : i64, scratch_operands = 0 : i64, tpu.core_type = #tpu.core_type<tc>, window_params = [{transform_indices = @transform_0, window_bounds = array<i64: 128, 8>}, {pipeline_mode = #tpu.pipeline_mode<synchronous>, transform_indices = @transform_1, window_bounds = array<i64: 8, 16>}, {pipeline_mode = #tpu.pipeline_mode<synchronous>, transform_indices = @transform_2, window_bounds = array<i64: 1, 16>}, {transform_indices = @transform_3, window_bounds = array<i64: 128, 16>}]} {
    %c0 = arith.constant 0 : index
    %c0_0 = arith.constant 0 : index
    %0 = vector.load %arg1[%c0, %c0_0] : memref<128x8xbf16, #tpu.memory_space<vmem>>, vector<128x8xbf16>
    %c0_1 = arith.constant 0 : index
    %c0_2 = arith.constant 0 : index
    %1 = vector.load %arg2[%c0_1, %c0_2] : memref<8x16xbf16, #tpu.memory_space<vmem>>, vector<8x16xbf16>
    %cst = arith.constant dense<0.000000e+00> : vector<128x16xf32>
    %2 = tpu.matmul %0, %1, %cst {dimension_numbers = #tpu.dot_dimension_numbers<[1], [0], [0], [1], [0, 0, 1, 1], [], []>} : vector<128x8xbf16>, vector<8x16xbf16>, vector<128x16xf32> -> vector<128x16xf32>
    %c0_3 = arith.constant 0 : index
    %c0_4 = arith.constant 0 : index
    %3 = vector.load %arg3[%c0_3, %c0_4] : memref<1x16xf32, #tpu.memory_space<vmem>>, vector<1x16xf32>
    %4 = vector.broadcast %3 : vector<1x16xf32> to vector<128x16xf32>
    %5 = arith.addf %2, %4 : vector<128x16xf32>
    %cst_5 = arith.constant 0.000000e+00 : f32
    %6 = vector.broadcast %cst_5 : f32 to vector<128x16xf32>
    %7 = arith.cmpf ogt, %5, %6 : vector<128x16xf32>
    %cst_6 = arith.constant 0.00999999977 : f32
    %8 = vector.broadcast %cst_6 : f32 to vector<128x16xf32>
    %9 = arith.mulf %8, %5 : vector<128x16xf32>
    %10 = arith.select %7, %5, %9 : vector<128x16xi1>, vector<128x16xf32>
    %11 = arith.truncf %10 : vector<128x16xf32> to vector<128x16xbf16>
    %c0_7 = arith.constant 0 : index
    %c0_8 = arith.constant 0 : index
    %12 = vector.load %arg4[%c0_7, %c0_8] : memref<128x16xbf16, #tpu.memory_space<vmem>>, vector<128x16xbf16>
    tpu.vector_store %arg4[%c0_7, %c0_8], %11 {strides = array<i32>} : memref<128x16xbf16, #tpu.memory_space<vmem>>, vector<128x16xbf16>,
    return
  }
  func.func @transform_0(%arg0: i32) -> (i32, i32) {
    %c0_i32 = arith.constant 0 : i32
    %c0_i32_0 = arith.constant 0 : i32
    return %arg0, %c0_i32 : i32, i32
  }
  func.func @transform_1(%arg0: i32) -> (i32, i32) {
    %c0_i32 = arith.constant 0 : i32
    %c0_i32_0 = arith.constant 0 : i32
    %c0_i32_1 = arith.constant 0 : i32
    return %c0_i32, %c0_i32_0 : i32, i32
  }
  func.func @transform_2(%arg0: i32) -> (i32, i32) {
    %c0_i32 = arith.constant 0 : i32
    %c0_i32_0 = arith.constant 0 : i32
    %c0_i32_1 = arith.constant 0 : i32
    return %c0_i32, %c0_i32_0 : i32, i32
  }
  func.func @transform_3(%arg0: i32) -> (i32, i32) {
    %c0_i32 = arith.constant 0 : i32
    %c0_i32_0 = arith.constant 0 : i32
    return %arg0, %c0_i32 : i32, i32
  }
}

</mosaic_0001>

<bundles_post_ra>
// kernel: tpu_custom_call.1
= control target key start
LH: loop header
LB: loop body
LE: loop exit
PB: predicated region body
PF: predicated region fallthrough
CT: control target
= control target key end

     0   :  { %s685_s12 = smov 0   ;;  %s775_s0 = inlined_call_operand.vmem [shape: bf16[512,8], index: 0, kind: input, shape index: {}]   ;;  %s776_s1 = inlined_call_operand.vmem [shape: bf16[8,16], index: 1, kind: input, shape index: {}]   ;;  %s777_s2 = inlined_call_operand.vmem [shape: f32[1,16], index: 2, kind: input, shape index: {}]   ;;  %s778_s3 = inlined_call_operand.vmem [shape: bf16[512,16], index: 3, kind: output, shape index: {}]  }
   0x1 LB: > { %s550_s13 = sadd.s32 4294967295, %s663_s12   ;;  %p554_p0 = scmp.ge.s32.totalorder %s663_s12, 1  ;;  %s663_s12 = sphi %s685_s12, %s13_s12  }
   0x2   : > { %p138_p1 = scmp.lt.s32.totalorder %s663_s12, 5 }
   0x4   : > { %p139_p2 = pnand %p554_p0, %p138_p1 }
   0x5   : > { %s555_s16 = sshll.u32 (!%p139_p2), %s550_s13, 4 }
   0x6   : > { %142 = sbr.rel (%p139_p2) target bundleno = 235 (0xeb), region = 32  ;;  %p163_p3 = scmp.lt.s32.totalorder (!%p139_p2), %s555_s16, 63 }
   0xb   : > { %v191_v0 = vld [vmem:[%s776_s1] sm:$0xf]  ;;  %vm264_vm0 = vcmask 1043456   ;;  %s780_s16 = smov (!%p163_p3, %s555_s16), 63  ;;  %vm239_vm1 = vcmask 64512   ;;  %vm477_vm3 = vcmask 125952  }
   0xc   : > { %639 = vmatprep.subr.msk.bf16.mxu0 %vm264_vm0, %v191_v0  ;;  %640 = vmatprep.subr.msk.bf16.mxu1 %vm264_vm0, %v191_v0  ;;  %v266_v1 = vsel %vm264_vm0, %v191_v0, 0  ;;  %s556_s17 = sshll.u32 %s780_s16, 2  ;;  %v715_v10 = vld [vmem:[%s777_s2] ss:$0 sm:$0xff] }
   0xd   : > { %620 = vmatpush3.bf16.msra.mxu0 %v266_v1  ;;  %638 = vmatpush3.bf16.msra.mxu1 %v266_v1  ;;  %s166_s20 = scalar_lea.vmem %s775_s0, %s556_s17  ;;  %s726_s25 = scalar_lea.vmem %s778_s3, %s556_s17 }
   0xe   : > { %v649_v2 = vld [vmem:[%s166_s20] sm:$0xff]   ;;  %v651_v4 = vld [vmem:[%s166_s20 + $0x8] sm:$0xff]   ;;  %v653_v6 = vld [vmem:[%s166_s20 + $0x10] sm:$0xff]  }
   0xf   : > { %v650_v3 = vld [vmem:[%s166_s20 + $0x20] sm:$0xff]   ;;  %621 = vmatprep.mubr.msk.bf16.mxu0 %vm239_vm1, %v649_v2  ;;  %v652_v5 = vld [vmem:[%s166_s20 + $0x28] sm:$0xff]   ;;  %v654_v7 = vld [vmem:[%s166_s20 + $0x30] sm:$0xff]  }
  0x10   : > { %629 = vmatprep.mubr.msk.bf16.mxu1 %vm239_vm1, %v650_v3  ;;  %622 = vmatmul.mubr.msk.bf16.vlgmr.msra.gmra.mxu0 %vm239_vm1, %v651_v4  ;;  %v655_v8 = vld [vmem:[%s166_s20 + $0x18] sm:$0xff]  }
  0x11   : > { %630 = vmatmul.mubr.msk.bf16.vlgmr.msra.gmra.mxu1 %vm239_vm1, %v652_v5  ;;  %625 = vmatprep.mubr.msk.bf16.mxu0 %vm239_vm1, %v653_v6  ;;  %v656_v9 = vld [vmem:[%s166_s20 + $0x38] sm:$0xff]  }
  0x12   : > { %633 = vmatprep.mubr.msk.bf16.mxu1 %vm239_vm1, %v654_v7 }
  0x18   : > { %626 = vmatmul.mubr.msk.bf16.gmra.mxu0 %vm239_vm1, %v655_v8 }
  0x19   : > { %634 = vmatmul.mubr.msk.bf16.gmra.mxu1 %vm239_vm1, %v656_v9 }
  0xd0   : > { %v623_v11 = vpop.f32.mrf.mxu0 }
  0xd1   : > { %v311_v12 = vadd.f32 %v623_v11, %v715_v10  ;;  %v631_v13 = vpop.f32.mrf.mxu1 }
  0xd2   : > { %v343_v14 = vadd.f32 %v631_v13, %v715_v10  ;;  %v302_v15 = vpop.f32.mrf.mxu0 }
  0xd3   : > { %vm367_vm2 = vcmp.gt.f32.partialorder %v311_v12, 0.0  ;;  %v383_v16 = vmul.f32 0.01, %v311_v12  ;;  %v303_v17 = vadd.f32 %v715_v10, %v302_v15  ;;  %v334_v18 = vpop.f32.mrf.mxu1 }
  0xd4   : > { %vm375_vm4 = vcmp.gt.f32.partialorder %v343_v14, 0.0  ;;  %v391_v19 = vmul.f32 0.01, %v343_v14  ;;  %v335_v20 = vadd.f32 %v715_v10, %v334_v18  ;;  %v624_v21 = vpop.f32.mrf.mxu0 }
  0xd5   : > { %v399_v22 = vsel %vm367_vm2, %v311_v12, %v383_v16  ;;  %vm365_vm5 = vcmp.gt.f32.partialorder %v303_v17, 0.0  ;;  %v381_v23 = vmul.f32 0.01, %v303_v17  ;;  %v314_v24 = vadd.f32 %v624_v21, %v715_v10  ;;  %v632_v25 = vpop.f32.mrf.mxu1 }
  0xd6   : > { %v596_v26 = vpack.c.bf16 %v399_v22, %v399_v22  ;;  %v407_v27 = vsel %vm375_vm4, %v343_v14, %v391_v19  ;;  %vm373_vm6 = vcmp.gt.f32.partialorder %v335_v20, 0.0  ;;  %v389_v28 = vmul.f32 0.01, %v335_v20  ;;  %v305_v29 = vpop.f32.mrf.mxu0 }
  0xd7   : > { %v604_v30 = vpack.c.bf16 %v407_v27, %v407_v27  ;;  %v397_v31 = vsel %vm365_vm5, %v303_v17, %v381_v23  ;;  %vm368_vm7 = vcmp.gt.f32.partialorder %v314_v24, 0.0  ;;  %v384_v32 = vmul.f32 0.01, %v314_v24  ;;  %v337_v33 = vpop.f32.mrf.mxu1 }
  0xd8   : > { %480 = vst.msk [vmem:[%s726_s25 + $0x8] sm:$0xf] %vm477_vm3, %v596_v26  ;;  %v594_v34 = vpack.c.bf16 %v397_v31, %v397_v31  ;;  %v405_v35 = vsel %vm373_vm6, %v335_v20, %v389_v28  ;;  %v346_v36 = vadd.f32 %v632_v25, %v715_v10  ;;  %v306_v37 = vadd.f32 %v715_v10, %v305_v29  ;;  %v627_v38 = vpop.f32.mrf.mxu0 }
  0xd9   : > { %488 = vst.msk [vmem:[%s726_s25 + $0x28] sm:$0xf] %vm477_vm3, %v604_v30  ;;  %v602_v39 = vpack.c.bf16 %v405_v35, %v405_v35  ;;  %v400_v40 = vsel %vm368_vm7, %v314_v24, %v384_v32  ;;  %v338_v41 = vadd.f32 %v715_v10, %v337_v33  ;;  %v327_v42 = vadd.f32 %v627_v38, %v715_v10  ;;  %v635_v43 = vpop.f32.mrf.mxu1 }
  0xda   : > { %478 = vst.msk [vmem:[%s726_s25] sm:$0xf] %vm477_vm3, %v594_v34  ;;  %v597_v44 = vpack.c.bf16 %v400_v40, %v400_v40  ;;  %vm376_vm8 = vcmp.gt.f32.partialorder %v346_v36, 0.0  ;;  %v392_v45 = vmul.f32 0.01, %v346_v36  ;;  %vm366_vm9 = vcmp.gt.f32.partialorder %v306_v37, 0.0  ;;  %v318_v46 = vpop.f32.mrf.mxu0 }
  0xdb   : > { %486 = vst.msk [vmem:[%s726_s25 + $0x20] sm:$0xf] %vm477_vm3, %v602_v39  ;;  %v382_v47 = vmul.f32 0.01, %v306_v37  ;;  %vm374_vm10 = vcmp.gt.f32.partialorder %v338_v41, 0.0  ;;  %vm371_vm11 = vcmp.gt.f32.partialorder %v327_v42, 0.0  ;;  %v350_v49 = vpop.f32.mrf.mxu1  ;;  %v359_v52 = vadd.f32 %v635_v43, %v715_v10 }
  0xdc   : > { %v390_v48 = vmul.f32 0.01, %v338_v41  ;;  %481 = vst.msk [vmem:[%s726_s25 + $0xc] sm:$0xf] %vm477_vm3, %v597_v44  ;;  %v408_v50 = vsel %vm376_vm8, %v346_v36, %v392_v45  ;;  %v387_v51 = vmul.f32 0.01, %v327_v42  ;;  %v319_v53 = vadd.f32 %v715_v10, %v318_v46  ;;  %v628_v54 = vpop.f32.mrf.mxu0 }
  0xdd   : > { %v605_v55 = vpack.c.bf16 %v408_v50, %v408_v50  ;;  %v398_v56 = vsel %vm366_vm9, %v306_v37, %v382_v47  ;;  %v351_v58 = vadd.f32 %v715_v10, %v350_v49  ;;  %v636_v59 = vpop.f32.mrf.mxu1  ;;  %vm379_vm12 = vcmp.gt.f32.partialorder %v359_v52, 0.0 }
  0xde   : > { %v406_v57 = vsel %vm374_vm10, %v338_v41, %v390_v48  ;;  %v595_v60 = vpack.c.bf16 %v398_v56, %v398_v56  ;;  %v403_v62 = vsel %vm371_vm11, %v327_v42, %v387_v51  ;;  %v321_v63 = vpop.f32.mrf.mxu0  ;;  %v395_v1 = vmul.f32 0.01, %v359_v52 }
  0xdf   : > { %v603_v61 = vpack.c.bf16 %v406_v57, %v406_v57  ;;  %489 = vst.msk [vmem:[%s726_s25 + $0x2c] sm:$0xf] %vm477_vm3, %v605_v55  ;;  %v600_v0 = vpack.c.bf16 %v403_v62, %v403_v62  ;;  %vm369_vm13 = vcmp.gt.f32.partialorder %v319_v53, 0.0  ;;  %v385_v2 = vmul.f32 0.01, %v319_v53  ;;  %v353_v3 = vpop.f32.mrf.mxu1 }
  0xe0   : > { %479 = vst.msk [vmem:[%s726_s25 + $0x4] sm:$0xf] %vm477_vm3, %v595_v60  ;;  %vm377_vm14 = vcmp.gt.f32.partialorder %v351_v58, 0.0  ;;  %v393_v4 = vmul.f32 0.01, %v351_v58  ;;  %v330_v5 = vadd.f32 %v628_v54, %v715_v10  ;;  %v362_v6 = vadd.f32 %v636_v59, %v715_v10 }
  0xe1   : > { %487 = vst.msk [vmem:[%s726_s25 + $0x24] sm:$0xf] %vm477_vm3, %v603_v61  ;;  %484 = vst.msk [vmem:[%s726_s25 + $0x18] sm:$0xf] %vm477_vm3, %v600_v0  ;;  %v411_v7 = vsel %vm379_vm12, %v359_v52, %v395_v1  ;;  %v401_v8 = vsel %vm369_vm13, %v319_v53, %v385_v2  ;;  %v322_v9 = vadd.f32 %v715_v10, %v321_v63 }
  0xe2   : > { %v354_v11 = vadd.f32 %v715_v10, %v353_v3  ;;  %v608_v12 = vpack.c.bf16 %v411_v7, %v411_v7  ;;  %v598_v13 = vpack.c.bf16 %v401_v8, %v401_v8  ;;  %v409_v14 = vsel %vm377_vm14, %v351_v58, %v393_v4 }
  0xe3   : > { %vm372_vm15 = vcmp.gt.f32.partialorder %v330_v5, 0.0  ;;  %v606_v15 = vpack.c.bf16 %v409_v14, %v409_v14  ;;  %v388_v16 = vmul.f32 0.01, %v330_v5  ;;  %vm380_vm0 = vcmp.gt.f32.partialorder %v362_v6, 0.0 }
  0xe4   : > { %v396_v17 = vmul.f32 0.01, %v362_v6  ;;  %492 = vst.msk [vmem:[%s726_s25 + $0x38] sm:$0xf] %vm477_vm3, %v608_v12  ;;  %482 = vst.msk [vmem:[%s726_s25 + $0x10] sm:$0xf] %vm477_vm3, %v598_v13 }
  0xe5   : > { %vm370_vm1 = vcmp.gt.f32.partialorder %v322_v9, 0.0  ;;  %v386_v18 = vmul.f32 0.01, %v322_v9  ;;  %vm378_vm2 = vcmp.gt.f32.partialorder %v354_v11, 0.0  ;;  %v394_v10 = vmul.f32 0.01, %v354_v11 }
  0xe6   : > { %490 = vst.msk [vmem:[%s726_s25 + $0x30] sm:$0xf] %vm477_vm3, %v606_v15  ;;  %v404_v19 = vsel %vm372_vm15, %v330_v5, %v388_v16  ;;  %v412_v20 = vsel %vm380_vm0, %v362_v6, %v396_v17 }
  0xe7   : > { %v601_v21 = vpack.c.bf16 %v404_v19, %v404_v19  ;;  %v609_v22 = vpack.c.bf16 %v412_v20, %v412_v20  ;;  %v402_v23 = vsel %vm370_vm1, %v322_v9, %v386_v18  ;;  %v410_v24 = vsel %vm378_vm2, %v354_v11, %v394_v10 }
  0xe8   : > { %v599_v25 = vpack.c.bf16 %v402_v23, %v402_v23  ;;  %v607_v26 = vpack.c.bf16 %v410_v24, %v410_v24 }
  0xe9   : > { %485 = vst.msk [vmem:[%s726_s25 + $0x1c] sm:$0xf] %vm477_vm3, %v601_v21  ;;  %493 = vst.msk [vmem:[%s726_s25 + $0x3c] sm:$0xf] %vm477_vm3, %v609_v22 }
  0xea   : > { %483 = vst.msk [vmem:[%s726_s25 + $0x14] sm:$0xf] %vm477_vm3, %v599_v25  ;;  %491 = vst.msk [vmem:[%s726_s25 + $0x34] sm:$0xf] %vm477_vm3, %v607_v26 }
  0xeb PF: > { %s13_s12 = sadd.s32 1, %s663_s12  }
  0xec   : > { %p10_p4 = scmp.ge.s32.totalorder %s13_s12, 6  }
  0xee   :  { %12 = sbr.rel (!%p10_p4) target bundleno = 1 (0x1), region = 62 }

</bundles_post_ra>
